<compile_context>
chip_gen: v6e
topology: v6e:2x2x1
jax: 0.10.0
libtpu: 0.0.40
codegen_flags: <defaults>
</compile_context>

<pallas_src>
import math

import jax
import jax.numpy as jnp
from jax.experimental import pallas as pl
from jax.experimental.pallas import tpu as pltpu

# SpikingNetwork hyper-params (dt comes from SpikingNetwork.__init__ default)
DT = 0.001
TAU = 0.010
V_TH = 0.5
BETA = math.exp(-DT / TAU)  # membrane leak; unused in a single step from reset


def _cdiv(a: int, b: int) -> int:
    return (a + b - 1) // b


def _round_up(x: int, m: int) -> int:
    return _cdiv(x, m) * m


# ----------------------------------------------------------------------------
# Kernel
# ----------------------------------------------------------------------------
def spiking_mlp_kernel(x_ref, w1_ref, b1_ref, w2_ref, b2_ref, out_ref):
    """Fused Linear -> LIF(step from reset state) -> Linear for one batch tile.

    x_ref:  [TB, D_IN]     f32 (cast to bf16 in-kernel; VALU has slack)
    w1_ref: [D_IN, H_P]    bf16     b1_ref: [1, H_P]     f32
    w2_ref: [H_P, D_OUT_P] bf16     b2_ref: [1, D_OUT_P] f32
    out_ref:[TB, D_OUT_P]  bf16
    """
    # fc1: bf16 operands, f32 accumulation on the MXU.
    x_bf16 = x_ref[...].astype(jnp.bfloat16)
    cur1 = jnp.dot(x_bf16, w1_ref[...], preferred_element_type=jnp.float32)
    cur1 = cur1 + b1_ref[...]  # (1, H_P) broadcasts over the batch tile

    # LIF neuron single step.  After SpikingNetwork.reset() the membrane
    # potential is 0, so v_new = beta*0 + cur1 = cur1 (dead state math removed).
    # Threshold compare on the f32 accumulator; spikes are exactly 0/1 so the
    # bf16 cast for the readout matmul is lossless.
    spikes = (cur1 >= jnp.float32(V_TH)).astype(jnp.bfloat16)

    # fc2 readout on spikes: bf16 operands, f32 accumulation on the MXU.
    out = jnp.dot(spikes, w2_ref[...], preferred_element_type=jnp.float32)
    out_ref[...] = (out + b2_ref[...]).astype(out_ref.dtype)


# ----------------------------------------------------------------------------
# One-time parameter preparation (hoisted out of the per-call path)
# ----------------------------------------------------------------------------
def prepare_spiking_params(w1, b1, w2, b2):
    """Pad/cast weights to lane-dense bf16 ONCE; cache and reuse the result.

    w1: [D_IN, H] f32   b1: [1, H] f32
    w2: [H, D_OUT] f32  b2: [1, D_OUT] f32
    Returns (w1p, b1p, w2p, b2p, d_out) with H / D_OUT padded to multiples
    of 128.  D_IN is left unpadded (x keeps its native feature extent).
    """
    d_in, H = w1.shape
    d_out = w2.shape[1]
    h_p = _round_up(H, 128)
    d_out_p = _round_up(d_out, 128)

    w1p = jnp.zeros((d_in, h_p), jnp.bfloat16).at[:, :H].set(
        w1.astype(jnp.bfloat16))
    b1p = jnp.zeros((1, h_p), jnp.float32).at[:, :H].set(b1)
    w2p = jnp.zeros((h_p, d_out_p), jnp.bfloat16).at[:H, :d_out].set(
        w2.astype(jnp.bfloat16))
    b2p = jnp.zeros((1, d_out_p), jnp.float32).at[:, :d_out].set(b2)
    return w1p, b1p, w2p, b2p, d_out


# ----------------------------------------------------------------------------
# Forward wrapper == SpikingNetwork.forward(x)
# ----------------------------------------------------------------------------
def _select_batch_tile(B: int) -> int:
    """16-row-aligned tile, >=2 grid steps for B>16 (v7x megacore), <=256 rows,
    minimal batch padding."""
    if B <= 16:
        return _round_up(B, 16)
    n_tiles = max(2, _cdiv(B, 256))
    return _round_up(_cdiv(B, n_tiles), 16)


def spiking_network_forward(x, params, *, tb=None, slice_output=True):
    """Run the fused inner net: Linear -> LIF(single step from reset) -> Linear.

    x:      [B, D_IN] f32
    params: output of prepare_spiking_params (padded bf16 weights, f32 biases)
    Returns [B, D_OUT] bf16 if slice_output else the lane-dense padded
    [B_pad, D_OUT_P] bf16 slab (cheaper for downstream consumers that can take
    padded outputs).
    """
    w1p, b1p, w2p, b2p, d_out = params
    B, d_in = x.shape
    d_in_w, h_p = w1p.shape
    d_out_p = w2p.shape[1]
    assert d_in == d_in_w, "x feature dim must match prepared W1"

    tb = _select_batch_tile(B) if tb is None else tb
    b_p = _round_up(B, tb)

    # Pad only the batch dim (keep x in f32; the bf16 cast happens in-kernel).
    xp = x if b_p == B else jnp.zeros((b_p, d_in), x.dtype).at[:B].set(x)

    flops = 2 * b_p * (d_in * h_p + h_p * d_out_p)
    bytes_accessed = (xp.size * 4          # x (f32 in)
                      + w1p.size * 2 + w2p.size * 2
                      + b1p.size * 4 + b2p.size * 4
                      + b_p * d_out_p * 2)  # out (bf16)

    out_p = pl.pallas_call(
        spiking_mlp_kernel,
        out_shape=jax.ShapeDtypeStruct((b_p, d_out_p), jnp.bfloat16),
        grid_spec=pltpu.PrefetchScalarGridSpec(
            num_scalar_prefetch=0,
            grid=(b_p // tb,),
            in_specs=[
                pl.BlockSpec((tb, d_in), lambda i: (i, 0)),      # x batch tile
                pl.BlockSpec((d_in, h_p), lambda i: (0, 0)),     # W1 (resident)
                pl.BlockSpec((1, h_p), lambda i: (0, 0)),        # b1
                pl.BlockSpec((h_p, d_out_p), lambda i: (0, 0)),  # W2 (resident)
                pl.BlockSpec((1, d_out_p), lambda i: (0, 0)),    # b2
            ],
            out_specs=pl.BlockSpec((tb, d_out_p), lambda i: (i, 0)),
        ),
        compiler_params=pltpu.CompilerParams(
            dimension_semantics=("parallel",)),
        cost_estimate=pl.CostEstimate(
            flops=flops, transcendentals=0, bytes_accessed=bytes_accessed),
    )(xp, w1p, b1p, w2p, b2p)

    if not slice_output:
        return out_p
    # Batch-dim slice is cheap; the feature slice only matters when D_OUT is
    # not already 128-aligned (as in this demo).
    return out_p[:B, :d_out]


if __name__ == "__main__":
    # Small, deterministic example shapes (H / D_OUT padded to 128 lanes once,
    # at parameter-preparation time).
    B, D_IN, H, D_OUT = 16, 32, 64, 16

    key = jax.random.PRNGKey(0)
    kx, k1, k2, k3, k4 = jax.random.split(key, 5)

    x = jax.random.normal(kx, (B, D_IN), dtype=jnp.float32)
    # Deterministic parameter init (synthetic; no checkpoint load).
    w1 = jax.random.normal(k1, (D_IN, H), dtype=jnp.float32) * (1.0 / jnp.sqrt(D_IN))
    b1 = jax.random.normal(k2, (1, H), dtype=jnp.float32) * 0.1
    w2 = jax.random.normal(k3, (H, D_OUT), dtype=jnp.float32) * (1.0 / jnp.sqrt(H))
    b2 = jax.random.normal(k4, (1, D_OUT), dtype=jnp.float32) * 0.1

    # One-time pad/cast of the parameters (not part of the per-call path).
    params = prepare_spiking_params(w1, b1, w2, b2)

    out = spiking_network_forward(x, params)
    jax.block_until_ready(out)

    # Pure-JAX reference of the fused path, with the same bf16-operand /
    # f32-accumulation / bf16-output numerics as the kernel.
    cur1 = jnp.dot(x.astype(jnp.bfloat16), w1.astype(jnp.bfloat16),
                   preferred_element_type=jnp.float32) + b1
    spikes = (cur1 >= V_TH).astype(jnp.bfloat16)
    ref = (jnp.dot(spikes, w2.astype(jnp.bfloat16),
                   preferred_element_type=jnp.float32) + b2).astype(jnp.bfloat16)

    assert out.shape == (B, D_OUT)
    assert out.dtype == jnp.bfloat16
    # Tolerances sized for bf16 output; spike decisions exactly at V_TH could
    # in principle flip with MXU accumulation order (test fragility only).
    assert jnp.allclose(out.astype(jnp.float32), ref.astype(jnp.float32),
                        atol=5e-2, rtol=2e-2)

    print("KERNEL_OK")
</pallas_src>

<mosaic_0001>
module attributes {stable_mosaic.version = 11 : i64} {
  func.func @spiking_mlp_kernel(%arg0: i32, %arg1: memref<16x32xf32, #tpu.memory_space<vmem>>, %arg2: memref<32x128xbf16, #tpu.memory_space<vmem>>, %arg3: memref<1x128xf32, #tpu.memory_space<vmem>>, %arg4: memref<128x128xbf16, #tpu.memory_space<vmem>>, %arg5: memref<1x128xf32, #tpu.memory_space<vmem>>, %arg6: memref<16x128xbf16, #tpu.memory_space<vmem>>) attributes {dimension_semantics = [#tpu.dimension_semantics<parallel>], iteration_bounds = array<i64: 1>, scalar_prefetch = 0 : i64, scratch_operands = 0 : i64, tpu.core_type = #tpu.core_type<tc>, window_params = [{transform_indices = @transform_0, window_bounds = array<i64: 16, 32>}, {pipeline_mode = #tpu.pipeline_mode<synchronous>, transform_indices = @transform_1, window_bounds = array<i64: 32, 128>}, {pipeline_mode = #tpu.pipeline_mode<synchronous>, transform_indices = @transform_2, window_bounds = array<i64: 1, 128>}, {pipeline_mode = #tpu.pipeline_mode<synchronous>, transform_indices = @transform_3, window_bounds = array<i64: 128, 128>}, {pipeline_mode = #tpu.pipeline_mode<synchronous>, transform_indices = @transform_4, window_bounds = array<i64: 1, 128>}, {transform_indices = @transform_5, window_bounds = array<i64: 16, 128>}]} {
    %c0 = arith.constant 0 : index
    %c0_0 = arith.constant 0 : index
    %0 = vector.load %arg1[%c0, %c0_0] : memref<16x32xf32, #tpu.memory_space<vmem>>, vector<16x32xf32>
    %1 = arith.truncf %0 : vector<16x32xf32> to vector<16x32xbf16>
    %c0_1 = arith.constant 0 : index
    %c0_2 = arith.constant 0 : index
    %2 = vector.load %arg2[%c0_1, %c0_2] : memref<32x128xbf16, #tpu.memory_space<vmem>>, vector<32x128xbf16>
    %cst = arith.constant dense<0.000000e+00> : vector<16x128xf32>
    %3 = tpu.matmul %1, %2, %cst {dimension_numbers = #tpu.dot_dimension_numbers<[1], [0], [0], [1], [0, 0, 1, 1], [], []>} : vector<16x32xbf16>, vector<32x128xbf16>, vector<16x128xf32> -> vector<16x128xf32>
    %c0_3 = arith.constant 0 : index
    %c0_4 = arith.constant 0 : index
    %4 = vector.load %arg3[%c0_3, %c0_4] : memref<1x128xf32, #tpu.memory_space<vmem>>, vector<1x128xf32>
    %5 = vector.broadcast %4 : vector<1x128xf32> to vector<16x128xf32>
    %6 = arith.addf %3, %5 : vector<16x128xf32>
    %cst_5 = arith.constant 5.000000e-01 : f32
    %7 = vector.broadcast %cst_5 : f32 to vector<16x128xf32>
    %8 = arith.cmpf oge, %6, %7 : vector<16x128xf32>
    %9 = arith.extui %8 : vector<16x128xi1> to vector<16x128xi32>
    %10 = arith.sitofp %9 : vector<16x128xi32> to vector<16x128xf32>
    %11 = arith.truncf %10 : vector<16x128xf32> to vector<16x128xbf16>
    %c0_6 = arith.constant 0 : index
    %c0_7 = arith.constant 0 : index
    %12 = vector.load %arg4[%c0_6, %c0_7] : memref<128x128xbf16, #tpu.memory_space<vmem>>, vector<128x128xbf16>
    %cst_8 = arith.constant dense<0.000000e+00> : vector<16x128xf32>
    %13 = tpu.matmul %11, %12, %cst_8 {dimension_numbers = #tpu.dot_dimension_numbers<[1], [0], [0], [1], [0, 0, 1, 1], [], []>} : vector<16x128xbf16>, vector<128x128xbf16>, vector<16x128xf32> -> vector<16x128xf32>
    %c0_9 = arith.constant 0 : index
    %c0_10 = arith.constant 0 : index
    %14 = vector.load %arg5[%c0_9, %c0_10] : memref<1x128xf32, #tpu.memory_space<vmem>>, vector<1x128xf32>
    %15 = vector.broadcast %14 : vector<1x128xf32> to vector<16x128xf32>
    %16 = arith.addf %13, %15 : vector<16x128xf32>
    %17 = arith.truncf %16 : vector<16x128xf32> to vector<16x128xbf16>
    %c0_11 = arith.constant 0 : index
    %c0_12 = arith.constant 0 : index
    %18 = vector.load %arg6[%c0_11, %c0_12] : memref<16x128xbf16, #tpu.memory_space<vmem>>, vector<16x128xbf16>
    tpu.vector_store %arg6[%c0_11, %c0_12], %17 {strides = array<i32>} : memref<16x128xbf16, #tpu.memory_space<vmem>>, vector<16x128xbf16>,
    return
  }
  func.func @transform_0(%arg0: i32) -> (i32, i32) {
    %c0_i32 = arith.constant 0 : i32
    %c0_i32_0 = arith.constant 0 : i32
    return %arg0, %c0_i32 : i32, i32
  }
  func.func @transform_1(%arg0: i32) -> (i32, i32) {
    %c0_i32 = arith.constant 0 : i32
    %c0_i32_0 = arith.constant 0 : i32
    %c0_i32_1 = arith.constant 0 : i32
    return %c0_i32, %c0_i32_0 : i32, i32
  }
  func.func @transform_2(%arg0: i32) -> (i32, i32) {
    %c0_i32 = arith.constant 0 : i32
    %c0_i32_0 = arith.constant 0 : i32
    %c0_i32_1 = arith.constant 0 : i32
    return %c0_i32, %c0_i32_0 : i32, i32
  }
  func.func @transform_3(%arg0: i32) -> (i32, i32) {
    %c0_i32 = arith.constant 0 : i32
    %c0_i32_0 = arith.constant 0 : i32
    %c0_i32_1 = arith.constant 0 : i32
    return %c0_i32, %c0_i32_0 : i32, i32
  }
  func.func @transform_4(%arg0: i32) -> (i32, i32) {
    %c0_i32 = arith.constant 0 : i32
    %c0_i32_0 = arith.constant 0 : i32
    %c0_i32_1 = arith.constant 0 : i32
    return %c0_i32, %c0_i32_0 : i32, i32
  }
  func.func @transform_5(%arg0: i32) -> (i32, i32) {
    %c0_i32 = arith.constant 0 : i32
    %c0_i32_0 = arith.constant 0 : i32
    return %arg0, %c0_i32 : i32, i32
  }
}

</mosaic_0001>

<bundles_post_ra>
// kernel: tpu_custom_call.1
= control target key start
LH: loop header
LB: loop body
LE: loop exit
PB: predicated region body
PF: predicated region fallthrough
CT: control target
= control target key end

     0   :  { %10 = vsyncpa [#allocation3], 0  ;;  %s522_s0 = inlined_call_operand.hbm [shape: f32[16,32], index: 0, kind: input, shape index: {}]   ;;  %s523_s1 = inlined_call_operand.hbm [shape: bf16[32,128], index: 1, kind: input, shape index: {}]   ;;  %s524_s2 = inlined_call_operand.vmem [shape: f32[1,128], index: 2, kind: input, shape index: {}]   ;;  %s525_s3 = inlined_call_operand.hbm [shape: bf16[128,128], index: 3, kind: input, shape index: {}]   ;;  %s526_s4 = inlined_call_operand.vmem [shape: f32[1,128], index: 4, kind: input, shape index: {}]   ;;  %s527_s5 = inlined_call_operand.hbm [shape: bf16[16,128], index: 5, kind: output, shape index: {}]  }
   0x1   :  { %11 = vsyncpa [#allocation6], 0 }
   0x2   :  { %12 = vsyncpa [#allocation4], 0  ;;  %s454_s18 = smov [#allocation5]  }
   0x3   :  { %s30_s19 = sshll.u32 %s454_s18, 4  ;;  %s31_s19 = int_to_ptr.vmem [resolvable:$true] %s30_s19 }
   0x4   :  { %s376_s20 = scalar_lea.vmem %s31_s19, 256  ;;  %p381_p1 = scmp.lt.s32.totalorder %s31_s19, %s31_s19 }
   0x5   :  { %p377_p0 = scmp.ne.s32.totalorder %s31_s19, %s376_s20  ;;  %p382_p2 = scmp.lt.s32.totalorder %s376_s20, %s376_s20 }
   0x7   :  { %p383_p3 = por %p382_p2, %p381_p1 }
   0x9   :  { %p384_p4 = pnand %p383_p3, %p377_p0 }
   0xb   :  { %387 = shalt.err (!%p384_p4)
}
   0xc   :  { %s455_s21 = smov 64   ;;  %s456_s22 = smov 4  }
   0xd   :  { %36 = dma.hbm_to_vmem [thread:$0]  %s523_s1, 256, %s31_s19, [#allocation6], %s455_s21, %s455_s21, %s456_s22  }
   0xe   :  { %s457_s25 = smov [#allocation2]  }
   0xf   :  { %s18_s26 = sshll.u32 %s457_s25, 4  ;;  %s19_s26 = int_to_ptr.vmem [resolvable:$true] %s18_s26 }
  0x10   :  { %s396_s27 = scalar_lea.vmem %s19_s26, 256  ;;  %p401_p6 = scmp.lt.s32.totalorder %s19_s26, %s19_s26 }
  0x11   :  { %p397_p5 = scmp.ne.s32.totalorder %s19_s26, %s396_s27  ;;  %p402_p7 = scmp.lt.s32.totalorder %s396_s27, %s396_s27 }
  0x13   :  { %p403_p8 = por %p402_p7, %p401_p6 }
  0x15   :  { %p404_p9 = pnand %p403_p8, %p397_p5 }
  0x17   :  { %407 = shalt.err (!%p404_p9)
}
  0x18   :  { %s458_s28 = smov 128   ;;  %s459_s29 = smov 8  }
  0x19   :  { %24 = dma.hbm_to_vmem [thread:$0]  %s522_s0, 256, %s19_s26, [#allocation3], %s458_s28, %s458_s28, %s459_s29  }
  0x1a   :  { %s460_s7 = smov [#allocation7]  }
  0x1b   :  { %s44_s8 = sshll.u32 %s460_s7, 4  ;;  %s45_s8 = int_to_ptr.vmem [resolvable:$true] %s44_s8 }
  0x1c   :  { %s416_s1 = scalar_lea.vmem %s45_s8, 1024  ;;  %p421_p11 = scmp.lt.s32.totalorder %s45_s8, %s45_s8 }
  0x1d   :  { %p417_p10 = scmp.ne.s32.totalorder %s45_s8, %s416_s1  ;;  %p422_p12 = scmp.lt.s32.totalorder %s416_s1, %s416_s1 }
  0x1f   :  { %p423_p13 = por %p422_p12, %p421_p11 }
  0x21   :  { %p424_p0 = pnand %p423_p13, %p417_p10 }
  0x23   :  { %427 = shalt.err (!%p424_p0)
}
  0x24   :  { %50 = dma.hbm_to_vmem [thread:$0]  %s525_s3, 1024, %s45_s8, [#allocation6], %s455_s21, %s455_s21, %s456_s22  }
  0x25   :  { %448 = dma.done.wait [#allocation3], 256  }
  0x26   :  { %449 = vsyncadd [#allocation3], 4294967040 }
  0x27   :  { %450 = dma.done.wait [#allocation6], 1280  }
  0x28   :  { %451 = vsyncadd [#allocation6], 4294966016  ;;  %v461_v0 = vmov 0.0   ;;  %vm462_vm0 = vmmov 0   ;;  %v358_v1 = vld [vmem:[#allocation5 + $0x8] sm:$0xff]   ;;  %v359_v2 = vld [vmem:[#allocation5] sm:$0xff]  }
  0x29   :  { %319 = vmatprep.subr.bf16.mxu0 %v461_v0  ;;  %323 = vmatprep.mubr.msk.bf16.mxu0 %vm462_vm0, %v461_v0  ;;  %v63_v3 = vld [vmem:[#allocation2] sm:$0xff]  ;;  %v64_v4 = vld [vmem:[#allocation2 + $0x8] sm:$0xff]  ;;  %v360_v5 = vld [vmem:[#allocation7 + $0x38] sm:$0xff]   ;;  %vm89_vm1 = vcmask 261120   ;;  %v463_v21 = vmov 1.0|1.0  }
  0x2a   :  { %327 = vmatprep.subr.bf16.mxu1 %v461_v0  ;;  %343 = vmatprep.mubr.msk.bf16.mxu1 %vm462_vm0, %v461_v0  ;;  %v65_v6 = vpack.c.bf16 %v64_v4, %v63_v3  ;;  %v361_v7 = vld [vmem:[#allocation7 + $0x30] sm:$0xff]   ;;  %v362_v8 = vld [vmem:[#allocation7 + $0x28] sm:$0xff]   ;;  %v363_v9 = vld [vmem:[#allocation7 + $0x20] sm:$0xff]   ;;  %s464_s13 = smov [#allocation8]  }
  0x2b   :  { %320 = vmatpush3.bf16.msra.mxu0 %v358_v1  ;;  %328 = vmatpush3.bf16.msra.mxu1 %v360_v5  ;;  %v364_v10 = vld [vmem:[#allocation7 + $0x18] sm:$0xff]   ;;  %v365_v11 = vld [vmem:[#allocation7 + $0x10] sm:$0xff]   ;;  %v366_v12 = vld [vmem:[#allocation7 + $0x8] sm:$0xff]  }
  0x2c   :  { %321 = vmatprep.subr.bf16.mxu0 %v461_v0  ;;  %329 = vmatprep.subr.bf16.mxu1 %v461_v0  ;;  %v367_v13 = vld [vmem:[#allocation7] sm:$0xff]  }
  0x2d   :  { %v281_v14 = vld [vmem:[%s524_s2] ss:$0 sm:$0xff]  ;;  %s268_s2 = sshll.u32 %s464_s13, 4  ;;  %s269_s2 = int_to_ptr.vmem [resolvable:$true] %s268_s2 }
  0x2e   :  { %v287_v23 = vld [vmem:[%s526_s4] ss:$0 sm:$0xff]  ;;  %s428_s14 = scalar_lea.vmem %s269_s2, 128  ;;  %p433_p2 = scmp.lt.s32.totalorder %s269_s2, %s269_s2 }
  0x2f   :  { %322 = vmatpush3.bf16.msra.mxu0 %v359_v2  ;;  %330 = vmatpush3.bf16.msra.mxu1 %v361_v7  ;;  %p429_p1 = scmp.ne.s32.totalorder %s269_s2, %s428_s14  ;;  %p434_p3 = scmp.lt.s32.totalorder %s428_s14, %s428_s14 }
  0x30   :  { %331 = vmatprep.subr.bf16.mxu1 %v461_v0 }
  0x31   :  { %p435_p4 = por %p434_p3, %p433_p2 }
  0x32   :  { %324 = vmatmul.mubr.msk.bf16.vlgmr.msra.gmra.mxu0 %vm89_vm1, %v65_v6 }
  0x33   :  { %332 = vmatpush3.bf16.msra.mxu1 %v362_v8  ;;  %p436_p5 = pnand %p435_p4, %p429_p1 }
  0x34   :  { %333 = vmatprep.subr.bf16.mxu1 %v461_v0 }
  0x37   :  { %334 = vmatpush3.bf16.msra.mxu1 %v363_v9 }
  0x38   :  { %335 = vmatprep.subr.bf16.mxu1 %v461_v0 }
  0x3b   :  { %336 = vmatpush3.bf16.msra.mxu1 %v364_v10 }
  0x3c   :  { %337 = vmatprep.subr.bf16.mxu1 %v461_v0 }
  0x3f   :  { %338 = vmatpush3.bf16.msra.mxu1 %v365_v11 }
  0x40   :  { %339 = vmatprep.subr.bf16.mxu1 %v461_v0 }
  0x43   :  { %340 = vmatpush3.bf16.msra.mxu1 %v366_v12 }
  0x44   :  { %341 = vmatprep.subr.bf16.mxu1 %v461_v0 }
  0x47   :  { %342 = vmatpush3.bf16.msra.mxu1 %v367_v13 }
  0xf2   :  { %v127_v15 = vpop.f32.mrf.mxu0 }
  0xf3   :  { %v128_v17 = vadd.f32 %v281_v14, %v127_v15 }
  0xf4   :  { %v325_v16 = vpop.f32.mrf.mxu0 }
  0xf5   :  { %vm134_vm2 = vcmp.ge.f32.partialorder %v128_v17, 0.5 }
  0xf6   :  { %v130_v18 = vpop.f32.mrf.mxu0 }
  0xf7   :  { %v131_v19 = vadd.f32 %v281_v14, %v130_v18 }
  0xf8   :  { %v326_v20 = vpop.f32.mrf.mxu0 }
  0xf9   :  { %vm135_vm3 = vcmp.ge.f32.partialorder %v131_v19, 0.5 }
  0xfa   :  { %vm296_vm4 = vmpackc.low %vm135_vm3, %vm134_vm2 }
  0xfb   :  { %344 = vmatmul.mubr.msk.bf16.vlgmr.msra.gmra.mxu1 %vm296_vm4, %v463_v21 }
 0x1bb   :  { %v246_v22 = vpop.f32.mrf.mxu1 }
 0x1bc   :  { %v247_v26 = vadd.f32 %v287_v23, %v246_v22 }
 0x1bd   :  { %v345_v24 = vpop.f32.mrf.mxu1 }
 0x1bf   :  { %v249_v25 = vpop.f32.mrf.mxu1 }
 0x1c0   :  { %v250_v27 = vadd.f32 %v287_v23, %v249_v25 }
 0x1c1   :  { %v346_v28 = vpop.f32.mrf.mxu1 }
 0x1c2   :  { %v305_v29 = vpack.c.bf16 %v250_v27, %v247_v26 }
 0x1c4   :  { %306 = vst [vmem:[#allocation8] sm:$0xff] %v305_v29  }
 0x1c5   :  { %439 = shalt.err (!%p436_p5)
}
 0x1c6   :  { %274 = dma.vmem_to_hbm [thread:$0]  %s269_s2, 128, %s527_s5, [#allocation4], %s455_s21, %s455_s21, %s456_s22  }
 0x1c7   :  { %452 = dma.done.wait [#allocation4], 128  }
 0x1c8   :  { %453 = vsyncadd [#allocation4], 4294967168 }
 0x1c9   :  { %278 = vsyncpa [#allocation3], 1 }
 0x1ca   :  { %279 = vsyncpa [#allocation6], 1 }
 0x1cb   :  { %280 = vsyncpa [#allocation4], 1 }

</bundles_post_ra>
